<compile_context>
chip_gen: v7x
topology: tpu7x:2x2x1
jax: 0.10.0
libtpu: 0.0.40
codegen_flags: <defaults>
</compile_context>

<pallas_src>
import functools
import math

import jax
import jax.numpy as jnp
from jax import lax
from jax.experimental import pallas as pl
from jax.experimental.pallas import tpu as pltpu


def _round_up(x, m):
    return (x + m - 1) // m * m


def _cdiv(a, b):
    return (a + b - 1) // b


def _gelu_exact(x):
    # nn.GELU() default = exact erf formulation.
    # (On v5e the EUP erf over a large slab can bound small-C cases; kept exact
    #  for semantic fidelity with the PyTorch module.)
    return 0.5 * x * (1.0 + lax.erf(x * (1.0 / math.sqrt(2.0))))


def _mlp_kernel(x_ref, w1_ref, b1_ref, w2_ref, b2_ref, o_ref, acc_ref, *, th, sub):
    # x_ref : (tm, Cin)    row tile (resident across hidden steps)
    # w1_ref: (Cin, th)    c_fc weight, hidden tile (bf16)
    # b1_ref: (1,  th)     c_fc bias, hidden tile (f32)
    # w2_ref: (th, Cout)   c_proj weight, hidden tile (bf16)
    # b2_ref: (1,  Cout)   c_proj bias (constant block, f32)
    # o_ref : (tm, Cout)   output row tile
    # acc_ref: (tm, Cout)  f32 VMEM accumulator for the second matmul
    hj = pl.program_id(1)

    @pl.when(hj == 0)
    def _():
        acc_ref[...] = jnp.zeros_like(acc_ref)

    x = x_ref[...]
    # Sub-chunk the hidden tile: keeps the live (tm, sub) f32 slab small and
    # lets matmul2 of chunk k overlap matmul1/GELU of chunk k+1.
    for c in range(th // sub):
        lo = c * sub
        # c_fc partial: bf16 MXU inputs, f32 accumulation.
        h = jnp.dot(x, w1_ref[:, lo:lo + sub], preferred_element_type=jnp.float32)
        h = h + b1_ref[:, lo:lo + sub].astype(jnp.float32)
        h = _gelu_exact(h)  # exact (erf) GELU in f32 on the VPU/EUP
        # c_proj partial: accumulate into the f32 scratch.
        acc_ref[...] += jnp.dot(h.astype(w2_ref.dtype), w2_ref[lo:lo + sub, :],
                                preferred_element_type=jnp.float32)

    @pl.when(hj == pl.num_programs(1) - 1)
    def _():
        out = acc_ref[...] + b2_ref[...].astype(jnp.float32)
        # dropout(p=0.5): identity (eval mode)
        o_ref[...] = out.astype(o_ref.dtype)


def mlp_forward(x, w1, b1, w2, b2, *, tm=512, th=None, use_bf16_mxu=True):
    """x: (B, T, Cin); w1: (Cin, H); b1: (H,); w2: (H, Cout); b2: (Cout,)."""
    B, T, Cin = x.shape
    Cin_w, H = w1.shape
    H_w, Cout = w2.shape
    assert Cin_w == Cin and H_w == H and b1.shape == (H,) and b2.shape == (Cout,)

    out_dtype = x.dtype
    mxu_dtype = jnp.bfloat16 if use_bf16_mxu else x.dtype

    M = B * T
    H_pad = _round_up(H, 128)

    # ---- VMEM budget (generation-aware; conservative v7x-per-TC fallback) ----
    try:
        phys_vmem = int(pltpu.get_tpu_info().vmem_capacity_bytes)
    except Exception:
        phys_vmem = 64 * 1024 * 1024
    budget = (phys_vmem * 3) // 4  # leave headroom for Mosaic internal scratch

    x_item = jnp.dtype(mxu_dtype).itemsize
    w_item = jnp.dtype(mxu_dtype).itemsize
    o_item = jnp.dtype(out_dtype).itemsize

    def fixed_bytes(tm_):
        return (2 * tm_ * Cin * x_item      # x row tile (double-buffered)
                + 2 * tm_ * Cout * o_item   # output row tile (double-buffered)
                + tm_ * Cout * 4            # f32 accumulator scratch
                + 2 * Cout * 4)             # b2 block

    def th_bytes(tm_, th_):
        sub_ = 256 if th_ % 256 == 0 else 128
        return (2 * (Cin + Cout) * th_ * w_item  # W1/W2 hidden tiles (double-buffered)
                + 2 * th_ * 4                    # b1 hidden tile
                + tm_ * sub_ * 8)                # live f32 sub-slab + bf16 copy headroom

    # ---- row tiling: balanced tiles; >= 2 row tiles so both v7x TCs get work ----
    n_row = max(1, _cdiv(M, tm))
    if n_row == 1 and M >= 16:
        n_row = 2
    tm_eff = _round_up(_cdiv(M, n_row), 8)
    # Shrink tm if even the smallest hidden tile would not fit the budget.
    while tm_eff > 8 and fixed_bytes(tm_eff) + th_bytes(tm_eff, 128) > budget:
        tm_eff = max(8, _round_up(tm_eff // 2, 8))
    M_pad = _round_up(M, tm_eff)

    # ---- hidden tiling: prefer fully resident weights (loaded once for the
    #      whole grid), else the largest streaming tile dividing H_pad ----
    if th is None:
        cands = [H_pad] + [c for c in (2048, 1024, 512, 256, 128)
                           if c < H_pad and H_pad % c == 0]
        th_eff = 128
        for c in cands:
            if fixed_bytes(tm_eff) + th_bytes(tm_eff, c) <= budget:
                th_eff = c
                break
    else:
        th_eff = min(_round_up(th, 128), H_pad)
        while H_pad % th_eff != 0:   # keep H_pad a multiple of th_eff (no extra pad)
            th_eff -= 128
    sub = 256 if th_eff % 256 == 0 else 128

    # ---- operand prep: cast once to the MXU dtype, pad only when needed ----
    x2d = x.reshape(M, Cin).astype(mxu_dtype)
    if M_pad != M:
        x2d = jnp.pad(x2d, ((0, M_pad - M), (0, 0)))  # padded rows sliced off below

    w1_p = w1.astype(mxu_dtype)
    w2_p = w2.astype(mxu_dtype)
    b1_p = b1.astype(jnp.float32)
    if H_pad != H:
        # Zero-padding the hidden dim is exact: padded W2 rows are zero.
        w1_p = jnp.pad(w1_p, ((0, 0), (0, H_pad - H)))
        w2_p = jnp.pad(w2_p, ((0, H_pad - H), (0, 0)))
        b1_p = jnp.pad(b1_p, ((0, H_pad - H),))
    b1_2d = b1_p.reshape(1, H_pad)
    b2_2d = b2.astype(jnp.float32).reshape(1, Cout)

    grid = (M_pad // tm_eff, H_pad // th_eff)

    footprint = fixed_bytes(tm_eff) + th_bytes(tm_eff, th_eff)
    vmem_limit = int(min(budget,
                         max(footprint + footprint // 2 + (4 << 20),
                             16 * 1024 * 1024)))

    kernel = functools.partial(_mlp_kernel, th=th_eff, sub=sub)

    out = pl.pallas_call(
        kernel,
        out_shape=jax.ShapeDtypeStruct((M_pad, Cout), out_dtype),
        grid_spec=pltpu.PrefetchScalarGridSpec(
            num_scalar_prefetch=0,
            grid=grid,
            in_specs=[
                pl.BlockSpec((tm_eff, Cin), lambda i, j: (i, 0)),    # x rows (resident over j)
                pl.BlockSpec((Cin, th_eff), lambda i, j: (0, j)),    # W1 hidden tile
                pl.BlockSpec((1, th_eff), lambda i, j: (0, j)),      # b1 hidden tile
                pl.BlockSpec((th_eff, Cout), lambda i, j: (j, 0)),   # W2 hidden tile
                pl.BlockSpec((1, Cout), lambda i, j: (0, 0)),        # b2 (constant block)
            ],
            out_specs=pl.BlockSpec((tm_eff, Cout), lambda i, j: (i, 0)),
            scratch_shapes=[pltpu.VMEM((tm_eff, Cout), jnp.float32)],
        ),
        compiler_params=pltpu.CompilerParams(
            dimension_semantics=("parallel", "arbitrary"),
            vmem_limit_bytes=vmem_limit,
        ),
    )(x2d, w1_p, b1_2d, w2_p, b2_2d)

    if M_pad != M:
        out = out[:M]
    return out.reshape(B, T, Cout)


if __name__ == "__main__":
    # Small shapes consistent with the module: n_embd = 128, batch = 2, seq = 8.
    B, T, C = 2, 8, 128
    key = jax.random.PRNGKey(0)
    kx, kw1, kb1, kw2, kb2 = jax.random.split(key, 5)

    x = jax.random.normal(kx, (B, T, C), dtype=jnp.float32)
    # Conv1D(n_state, nx): weight (nx, n_state), bias (n_state,); here n_state == nx == C.
    w1 = jax.random.normal(kw1, (C, C), dtype=jnp.float32) * 0.02
    b1 = jax.random.normal(kb1, (C,), dtype=jnp.float32) * 0.02
    w2 = jax.random.normal(kw2, (C, C), dtype=jnp.float32) * 0.02
    b2 = jax.random.normal(kb2, (C,), dtype=jnp.float32) * 0.02

    y = mlp_forward(x, w1, b1, w2, b2)
    jax.block_until_ready(y)

    # Reference matching the kernel arithmetic (bf16 MXU inputs, f32 accumulation).
    def ref_bf16(x, w1, b1, w2, b2):
        x2d = x.reshape(-1, C).astype(jnp.bfloat16)
        h = jnp.dot(x2d, w1.astype(jnp.bfloat16),
                    preferred_element_type=jnp.float32) + b1
        h = 0.5 * h * (1.0 + lax.erf(h / math.sqrt(2.0)))
        o = jnp.dot(h.astype(jnp.bfloat16), w2.astype(jnp.bfloat16),
                    preferred_element_type=jnp.float32) + b2
        return o.reshape(x.shape)

    # Pure-f32 reference (module semantics); looser tolerance due to bf16 MXU inputs.
    def ref_f32(x, w1, b1, w2, b2):
        x2d = x.reshape(-1, C)
        h = x2d @ w1 + b1
        h = 0.5 * h * (1.0 + lax.erf(h / math.sqrt(2.0)))
        o = h @ w2 + b2
        return o.reshape(x.shape)

    y_bf16 = ref_bf16(x, w1, b1, w2, b2)
    y_f32 = ref_f32(x, w1, b1, w2, b2)
    assert jnp.allclose(y, y_bf16, atol=1e-4, rtol=1e-4), "mismatch vs bf16-math reference"
    assert jnp.allclose(y, y_f32, atol=1e-2, rtol=1e-2), "mismatch vs f32 reference"

    print("KERNEL_OK")
</pallas_src>

<mosaic_0001>
module attributes {stable_mosaic.version = 11 : i64} {
  func.func @_mlp_kernel(%arg0: i32, %arg1: i32, %arg2: memref<8x128xbf16, #tpu.memory_space<vmem>>, %arg3: memref<128x128xbf16, #tpu.memory_space<vmem>>, %arg4: memref<1x128xf32, #tpu.memory_space<vmem>>, %arg5: memref<128x128xbf16, #tpu.memory_space<vmem>>, %arg6: memref<1x128xf32, #tpu.memory_space<vmem>>, %arg7: memref<8x128xf32, #tpu.memory_space<vmem>>, %arg8: memref<8x128xf32, #tpu.memory_space<vmem>>) attributes {dimension_semantics = [#tpu.dimension_semantics<parallel>, #tpu.dimension_semantics<arbitrary>], iteration_bounds = array<i64: 2, 1>, scalar_prefetch = 0 : i64, scratch_operands = 1 : i64, tpu.core_type = #tpu.core_type<tc>, window_params = [{transform_indices = @transform_0, window_bounds = array<i64: 8, 128>}, {transform_indices = @transform_1, window_bounds = array<i64: 128, 128>}, {transform_indices = @transform_2, window_bounds = array<i64: 1, 128>}, {transform_indices = @transform_3, window_bounds = array<i64: 128, 128>}, {pipeline_mode = #tpu.pipeline_mode<synchronous>, transform_indices = @transform_4, window_bounds = array<i64: 1, 128>}, {transform_indices = @transform_5, window_bounds = array<i64: 8, 128>}]} {
    %c0_i32 = arith.constant 0 : i32
    %0 = arith.cmpi eq, %arg1, %c0_i32 : i32
    %1 = arith.extui %0 : i1 to i32
    %c0_i32_0 = arith.constant 0 : i32
    %2 = arith.cmpi ne, %1, %c0_i32_0 : i32
    scf.if %2 {
      %cst_18 = arith.constant 0.000000e+00 : f32
      %26 = vector.broadcast %cst_18 : f32 to vector<8x128xf32>
      %c0_19 = arith.constant 0 : index
      %c0_20 = arith.constant 0 : index
      %27 = vector.load %arg8[%c0_19, %c0_20] : memref<8x128xf32, #tpu.memory_space<vmem>>, vector<8x128xf32>
      tpu.vector_store %arg8[%c0_19, %c0_20], %26 {strides = array<i32>} : memref<8x128xf32, #tpu.memory_space<vmem>>, vector<8x128xf32>,
    } else {
    }
    %c0 = arith.constant 0 : index
    %c0_1 = arith.constant 0 : index
    %3 = vector.load %arg2[%c0, %c0_1] : memref<8x128xbf16, #tpu.memory_space<vmem>>, vector<8x128xbf16>
    %c0_2 = arith.constant 0 : index
    %c0_3 = arith.constant 0 : index
    %4 = vector.load %arg3[%c0_2, %c0_3] : memref<128x128xbf16, #tpu.memory_space<vmem>>, vector<128x128xbf16>
    %cst = arith.constant dense<0.000000e+00> : vector<8x128xf32>
    %5 = tpu.matmul %3, %4, %cst {dimension_numbers = #tpu.dot_dimension_numbers<[1], [0], [0], [1], [0, 0, 1, 1], [], []>} : vector<8x128xbf16>, vector<128x128xbf16>, vector<8x128xf32> -> vector<8x128xf32>
    %c0_4 = arith.constant 0 : index
    %c0_5 = arith.constant 0 : index
    %6 = vector.load %arg4[%c0_4, %c0_5] : memref<1x128xf32, #tpu.memory_space<vmem>>, vector<1x128xf32>
    %7 = vector.broadcast %6 : vector<1x128xf32> to vector<8x128xf32>
    %8 = arith.addf %5, %7 : vector<8x128xf32>
    %cst_6 = arith.constant 5.000000e-01 : f32
    %9 = vector.broadcast %cst_6 : f32 to vector<8x128xf32>
    %10 = arith.mulf %9, %8 : vector<8x128xf32>
    %cst_7 = arith.constant 0.707106769 : f32
    %11 = vector.broadcast %cst_7 : f32 to vector<8x128xf32>
    %12 = arith.mulf %8, %11 : vector<8x128xf32>
    %13 = math.erf %12 : vector<8x128xf32>
    %cst_8 = arith.constant 1.000000e+00 : f32
    %14 = vector.broadcast %cst_8 : f32 to vector<8x128xf32>
    %15 = arith.addf %14, %13 : vector<8x128xf32>
    %16 = arith.mulf %10, %15 : vector<8x128xf32>
    %c0_9 = arith.constant 0 : index
    %c0_10 = arith.constant 0 : index
    %17 = vector.load %arg8[%c0_9, %c0_10] : memref<8x128xf32, #tpu.memory_space<vmem>>, vector<8x128xf32>
    %18 = arith.truncf %16 : vector<8x128xf32> to vector<8x128xbf16>
    %c0_11 = arith.constant 0 : index
    %c0_12 = arith.constant 0 : index
    %19 = vector.load %arg5[%c0_11, %c0_12] : memref<128x128xbf16, #tpu.memory_space<vmem>>, vector<128x128xbf16>
    %cst_13 = arith.constant dense<0.000000e+00> : vector<8x128xf32>
    %20 = tpu.matmul %18, %19, %cst_13 {dimension_numbers = #tpu.dot_dimension_numbers<[1], [0], [0], [1], [0, 0, 1, 1], [], []>} : vector<8x128xbf16>, vector<128x128xbf16>, vector<8x128xf32> -> vector<8x128xf32>
    %21 = arith.addf %17, %20 : vector<8x128xf32>
    %c0_14 = arith.constant 0 : index
    %c0_15 = arith.constant 0 : index
    %22 = vector.load %arg8[%c0_14, %c0_15] : memref<8x128xf32, #tpu.memory_space<vmem>>, vector<8x128xf32>
    tpu.vector_store %arg8[%c0_14, %c0_15], %21 {strides = array<i32>} : memref<8x128xf32, #tpu.memory_space<vmem>>, vector<8x128xf32>,
    %c0_i32_16 = arith.constant 0 : i32
    %23 = arith.cmpi eq, %arg1, %c0_i32_16 : i32
    %24 = arith.extui %23 : i1 to i32
    %c0_i32_17 = arith.constant 0 : i32
    %25 = arith.cmpi ne, %24, %c0_i32_17 : i32
    scf.if %25 {
      %c0_18 = arith.constant 0 : index
      %c0_19 = arith.constant 0 : index
      %26 = vector.load %arg8[%c0_18, %c0_19] : memref<8x128xf32, #tpu.memory_space<vmem>>, vector<8x128xf32>
      %c0_20 = arith.constant 0 : index
      %c0_21 = arith.constant 0 : index
      %27 = vector.load %arg6[%c0_20, %c0_21] : memref<1x128xf32, #tpu.memory_space<vmem>>, vector<1x128xf32>
      %28 = vector.broadcast %27 : vector<1x128xf32> to vector<8x128xf32>
      %29 = arith.addf %26, %28 : vector<8x128xf32>
      %c0_22 = arith.constant 0 : index
      %c0_23 = arith.constant 0 : index
      %30 = vector.load %arg7[%c0_22, %c0_23] : memref<8x128xf32, #tpu.memory_space<vmem>>, vector<8x128xf32>
      tpu.vector_store %arg7[%c0_22, %c0_23], %29 {strides = array<i32>} : memref<8x128xf32, #tpu.memory_space<vmem>>, vector<8x128xf32>,
    } else {
    }
    return
  }
  func.func @transform_0(%arg0: i32, %arg1: i32) -> (i32, i32) {
    %c0_i32 = arith.constant 0 : i32
    %c0_i32_0 = arith.constant 0 : i32
    return %arg0, %c0_i32 : i32, i32
  }
  func.func @transform_1(%arg0: i32, %arg1: i32) -> (i32, i32) {
    %c0_i32 = arith.constant 0 : i32
    %c0_i32_0 = arith.constant 0 : i32
    return %c0_i32, %arg1 : i32, i32
  }
  func.func @transform_2(%arg0: i32, %arg1: i32) -> (i32, i32) {
    %c0_i32 = arith.constant 0 : i32
    %c0_i32_0 = arith.constant 0 : i32
    return %c0_i32, %arg1 : i32, i32
  }
  func.func @transform_3(%arg0: i32, %arg1: i32) -> (i32, i32) {
    %c0_i32 = arith.constant 0 : i32
    %c0_i32_0 = arith.constant 0 : i32
    return %arg1, %c0_i32 : i32, i32
  }
  func.func @transform_4(%arg0: i32, %arg1: i32) -> (i32, i32) {
    %c0_i32 = arith.constant 0 : i32
    %c0_i32_0 = arith.constant 0 : i32
    %c0_i32_1 = arith.constant 0 : i32
    return %c0_i32, %c0_i32_0 : i32, i32
  }
  func.func @transform_5(%arg0: i32, %arg1: i32) -> (i32, i32) {
    %c0_i32 = arith.constant 0 : i32
    %c0_i32_0 = arith.constant 0 : i32
    return %arg0, %c0_i32 : i32, i32
  }
}

</mosaic_0001>

<bundles_post_ra>
// kernel: tpu_custom_call.1
= control target key start
LH: loop header
LB: loop body
LE: loop exit
PB: predicated region body
PF: predicated region fallthrough
CT: control target
= control target key end

     0   :  { %10 = vsyncpa [#allocation4], 0  ;;  %s1353_s0 = inlined_call_operand.hbm [shape: bf16[16,128], index: 0, kind: input, shape index: {}]   ;;  %s1354_s1 = inlined_call_operand.hbm [shape: bf16[128,128], index: 1, kind: input, shape index: {}]   ;;  %s1355_s2 = inlined_call_operand.vmem [shape: f32[1,128], index: 2, kind: input, shape index: {}]   ;;  %s1356_s3 = inlined_call_operand.hbm [shape: bf16[128,128], index: 3, kind: input, shape index: {}]   ;;  %s1357_s4 = inlined_call_operand.vmem [shape: f32[1,128], index: 4, kind: input, shape index: {}]   ;;  %s1358_s5 = inlined_call_operand.hbm [shape: f32[16,128], index: 5, kind: output, shape index: {}]  }
   0x1   :  { %12 = vsyncpa [#allocation4 + $0x1], 0 }
   0x2   :  { %13 = vsyncpa [#allocation7], 0 }
   0x3   :  { %14 = vsyncpa [#allocation5], 0 }
   0x4   :  { %16 = vsyncpa [#allocation5 + $0x1], 0  ;;  %s1093_s18 = smov 0   ;;  %s1095_s19 = smov 0  }
   0x5   :  { %s1097_s20 = smov 0   ;;  %s1099_s21 = smov 0  }
   0x6   :  { %s1101_s22 = smov 0   ;;  %s1103_s23 = smov 0  }
   0x7 LB: > { %s682_s24 = sadd.s32 4294967295, %s1053_s23   ;;  %s683_s25 = sadd.s32 4294967294, %s1053_s23   ;;  %s1053_s23 = sphi %s1103_s23, %s22_s23   ;;  %s1049_s22 = sphi %s1101_s22, %s1380_s22   ;;  %s1045_s21 = sphi %s1099_s21, %s1379_s21   ;;  %s1041_s20 = sphi %s1097_s20, %s1378_s20   ;;  %s1037_s19 = sphi %s1095_s19, %s1377_s19   ;;  %s1033_s18 = sphi %s1093_s18, %s1376_s18  }
   0x8   : > { %p54_p0 = scmp.ne.s32.totalorder %s1037_s19, %s1033_s18  ;;  %p1127_p1 = scmp.eq.s32.totalorder %s682_s24, 0 }
   0x9   : > { %p1131_p2 = scmp.eq.s32.totalorder %s682_s24, 1  ;;  %p183_p3 = scmp.eq.s32.totalorder %s683_s25, 1 }
   0xa   : > { %s1363_s26 = scalar_select %p1127_p1, 1, 0 }
   0xb   : > { %p1137_p4 = por %p1127_p1, %p54_p0  ;;  %p684_p5 = scmp.ge.s32.totalorder %s1053_s23, 1 }
   0xc   : > { %p1142_p6 = por %p183_p3, %p54_p0  ;;  %p190_p7 = scmp.lt.s32.totalorder %s1053_s23, 3 }
   0xd   : > { %s1365_s28 = scalar_select %p1137_p4, 1, 0 }
   0xe   : > { %s1366_s29 = scalar_select %p1142_p6, 1, 0 }
   0xf   : > { %p1147_p8 = pnand %p684_p5, %p190_p7  ;;  %s1055_s6 = smov [#allocation6]  }
  0x10   : > { %s204_s7 = sshll.u32 %s1055_s6, 4  ;;  %s1056_s9 = smov [#allocation8]   ;;  %s1151_s7 = int_to_ptr.vmem [resolvable:$true] %s204_s7 }
  0x11   : > { %p788_p9 = pneg %p1147_p8  ;;  %s226_s10 = sshll.u32 %s1056_s9, 4  ;;  %s1162_s10 = int_to_ptr.vmem [resolvable:$true] %s226_s10 }
  0x12   : > { %s881_s13 = scalar_lea.hbm %s1354_s1, 1024 }
  0x13   : > { %p1158_p11 = pnand %p788_p9, %p1127_p1  ;;  %p882_p12 = scmp.ne.s32.totalorder %s1354_s1, %s881_s13 }
  0x14   : > { %p888_p5 = scmp.lt.u32.totalorder %s881_s13, %s1354_s1 }
  0x15   : > { %p883_p13 = pneg %p1158_p11 }
  0x17   : > { %p884_p0 = pnand %p883_p13, %p882_p12 }
  0x19   : > { %p885_p3 = pneg %p884_p0 }
  0x1b   : > { %p890_p7 = pnand %p888_p5, %p885_p3 }
  0x1d   : > { %893 = shalt.err (!%p890_p7)
}
  0x1e   : > { %s894_s24 = scalar_lea.vmem %s1151_s7, 1024  ;;  %p902_p1 = scmp.lt.s32.totalorder %s1151_s7, %s1151_s7 }
  0x1f   : > { %p895_p9 = scmp.ne.s32.totalorder %s1151_s7, %s894_s24  ;;  %p903_p12 = scmp.lt.s32.totalorder %s894_s24, %s894_s24 }
  0x21   : > { %p897_p10 = pnand %p895_p9, %p883_p13  ;;  %p904_p0 = por %p903_p12, %p902_p1 }
  0x23   : > { %p898_p6 = pneg %p897_p10 }
  0x25   : > { %p905_p4 = pnand %p904_p0, %p898_p6 }
  0x27   : > { %908 = shalt.err (!%p905_p4)
}
  0x28   : > { %s1057_s25 = smov 64   ;;  %s1058_s6 = smov 4  }
  0x29   : > { %791 = dma.hbm_to_vmem [thread:$0]  (!%p1158_p11), %s1354_s1, 1024, %s1151_s7, [#allocation7], %s1057_s25, %s1057_s25, %s1058_s6  }
  0x2a   : > { %s909_s14 = scalar_lea.hbm %s1356_s3, 1024 }
  0x2b   : > { %p910_p1 = scmp.ne.s32.totalorder %s1356_s3, %s909_s14  ;;  %p916_p10 = scmp.lt.u32.totalorder %s909_s14, %s1356_s3 }
  0x2d   : > { %p912_p4 = pnand %p910_p1, %p883_p13 }
  0x2f   : > { %p913_p6 = pneg %p912_p4 }
  0x31   : > { %p918_p3 = pnand %p916_p10, %p913_p6 }
  0x33   : > { %921 = shalt.err (!%p918_p3)
}
  0x34   : > { %s922_s7 = scalar_lea.vmem %s1162_s10, 1024  ;;  %p930_p12 = scmp.lt.s32.totalorder %s1162_s10, %s1162_s10 }
  0x35   : > { %p923_p5 = scmp.ne.s32.totalorder %s1162_s10, %s922_s7  ;;  %p931_p0 = scmp.lt.s32.totalorder %s922_s7, %s922_s7 }
  0x37   : > { %p925_p7 = pnand %p923_p5, %p883_p13  ;;  %p932_p1 = por %p931_p0, %p930_p12 }
  0x39   : > { %p926_p9 = pneg %p925_p7 }
  0x3b   : > { %p933_p4 = pnand %p932_p1, %p926_p9 }
  0x3d   : > { %936 = shalt.err (!%p933_p4)
}
  0x3e   : > { %794 = dma.hbm_to_vmem [thread:$0]  (!%p1158_p11), %s1356_s3, 1024, %s1162_s10, [#allocation7], %s1057_s25, %s1057_s25, %s1058_s6  }
  0x3f   : > { %s34_s12 = sadd.s32 1, %s1049_s22  ;;  %s41_s13 = sadd.s32 1, %s1041_s20 }
  0x40   : > { %p36_p13 = scmp.ge.s32.totalorder %s34_s12, 2  ;;  %p48_p6 = scmp.ne.s32.totalorder %s1041_s20, %s1037_s19 }
  0x41   : > { %p49_p10 = scmp.eq.s32.totalorder %s1053_s23, 0  ;;  %p805_p3 = scmp.lt.s32.totalorder %s1053_s23, 2 }
  0x42   : > { %s1382_s12 = smov (%p36_p13, %s34_s12), 0  ;;  %p1226_p7 = por %p1131_p2, %p48_p6 }
  0x43   : > { %p50_p5 = por %p49_p10, %p48_p6  ;;  %s38_s14 = ssub.s32 %s1049_s22, %s1382_s12 }
  0x44   : > { %s1369_s8 = scalar_select %p1226_p7, 1, 0 }
  0x45   : > { %s243_s15 = sand.u32 1, %s1041_s20   ;;  %p39_p9 = scmp.eq.s32.totalorder %s38_s14, 0 }
  0x46   : > { %s689_s10 = sshll.u32 %s243_s15, 2  ;;  %s690_s25 = sshll.u32 %s1049_s22, 6 }
  0x47   : > { %s1235_s6 = scalar_select %p39_p9, %s1041_s20, %s41_s13  }
  0x48   : > { %s1240_s24 = scalar_lea.hbm %s1353_s0, %s690_s25  ;;  %s247_s27 = scalar_lea.vmem [#allocation3], %s689_s10 }
  0x49   : > { %s254_s7 = sshll.u32 %s247_s27, 4  ;;  %p1244_p2 = pnand %p805_p3, %p50_p5  ;;  %s1248_s7 = int_to_ptr.vmem [resolvable:$true] %s254_s7 }
  0x4a   : > { %s244_s11 = scalar_lea.sflag [#allocation4], %s243_s15  ;;  %s937_s13 = scalar_lea.hbm %s1240_s24, 64 }
  0x4b   : > { %p938_p11 = scmp.ne.s32.totalorder %s1240_s24, %s937_s13  ;;  %p939_p12 = pneg %p1244_p2 }
  0x4c   : > { %s942_s25 = scalar_lea.hbm %s1353_s0, 128  ;;  %p943_p4 = scmp.lt.u32.totalorder %s1240_s24, %s1353_s0 }
  0x4d   : > { %p940_p0 = pnand %p939_p12, %p938_p11  ;;  %p944_p13 = scmp.lt.u32.totalorder %s942_s25, %s937_s13 }
  0x4e   : > { %p946_p10 = scmp.lt.u32.totalorder %s937_s13, %s1240_s24 }
  0x4f   : > { %p941_p1 = pneg %p940_p0  ;;  %p945_p6 = por %p944_p13, %p943_p4 }
  0x51   : > { %p947_p3 = por %p946_p10, %p945_p6 }
  0x53   : > { %p948_p5 = pnand %p947_p3, %p941_p1 }
  0x55   : > { %951 = shalt.err (!%p948_p5)
}
  0x56   : > { %s952_s15 = scalar_lea.vmem %s1248_s7, 64  ;;  %s1059_s27 = smov [#allocation3]  }
  0x57   : > { %p953_p9 = scmp.ne.s32.totalorder %s1248_s7, %s952_s15  ;;  %s957_s14 = sshll.u32 %s1059_s27, 4  ;;  %s958_s14 = int_to_ptr.vmem [resolvable:$false] %s957_s14 }
  0x58   : > { %s959_s10 = scalar_lea.vmem %s958_s14, 128  ;;  %p960_p7 = scmp.lt.s32.totalorder %s1248_s7, %s958_s14 }
  0x59   : > { %p955_p11 = pnand %p953_p9, %p939_p12  ;;  %p961_p4 = scmp.lt.s32.totalorder %s959_s10, %s952_s15 }
  0x5b   : > { %p956_p0 = pneg %p955_p11  ;;  %p962_p13 = por %p961_p4, %p960_p7 }
  0x5d   : > { %p963_p6 = pnand %p962_p13, %p956_p0 }
  0x5f   : > { %966 = shalt.err (!%p963_p6)
}
  0x60   : > { %798 = dma.hbm_to_vmem [thread:$0]  (!%p1244_p2), %s1240_s24, 64, %s1248_s7, %s244_s11  }
  0x61   : > { %263 = sbr.rel (%p1147_p8) target bundleno = 603 (0x25b), region = 40  ;;  %s1278_s13 = sand.u32 (!%p1147_p8), 1, %s1037_s19  }
  0x62   : > { %s692_s25 = sshll.u32 (!%p1147_p8), %s1278_s13, 2  ;;  %s266_s16 = scalar_lea.sflag (!%p1147_p8), [#allocation4], %s1278_s13 }
  0x63   : > { %s1282_s17 = scalar_lea.vmem (!%p1147_p8), [#allocation3], %s692_s25  ;;  %p1371_p7 = scmp.ne.s32.totalorder (!%p1147_p8), %s1365_s28, 0 }
  0x68   : > { %1020 = dma.done.wait (%p1371_p7), %s266_s16, 64  }
  0x69   : > { %1022 = vsyncadd (%p1371_p7), %s266_s16, 4294967232  ;;  %p1372_p2 = scmp.ne.s32.totalorder %s1363_s26, 0 }
  0x6b   : > { %1024 = dma.done.wait (%p1372_p2), [#allocation7], 2048  }
  0x6c   : > { %1026 = vsyncadd (%p1372_p2), [#allocation7], 4294965248  ;;  %v1060_v0 = vmov 0.0   ;;  %vm1061_vm0 = vmmov 0   ;;  %v863_v1 = vld [vmem:[#allocation6] sm:$0xff]   ;;  %v864_v2 = vld [vmem:[#allocation6 + $0x8] sm:$0xff]  }
  0x6d   : > { %736 = vmatprep.subr.bf16.mxu0 %v1060_v0  ;;  %752 = vmatprep.mubr.msk.bf16.mxu0 %vm1061_vm0, %v1060_v0  ;;  %v865_v3 = vld [vmem:[#allocation6 + $0x10] sm:$0xff]   ;;  %v871_v4 = vld [vmem:[#allocation8] sm:$0xff]   ;;  %v866_v5 = vld [vmem:[#allocation6 + $0x18] sm:$0xff]   ;;  %s695_s30 = sshll.u32 %s1278_s13, 3  ;;  %s715_s9 = sshll.u32 %s1045_s21, 7 }
  0x6e   : > { %756 = vmatprep.subr.bf16.mxu1 %v1060_v0  ;;  %772 = vmatprep.mubr.msk.bf16.mxu1 %vm1061_vm0, %v1060_v0  ;;  %v872_v6 = vld [vmem:[#allocation8 + $0x8] sm:$0xff]   ;;  %v867_v7 = vld [vmem:[#allocation6 + $0x20] sm:$0xff]   ;;  %v873_v8 = vld [vmem:[#allocation8 + $0x10] sm:$0xff]   ;;  %s306_s11 = scalar_lea.vmem [#allocation9], %s695_s30  ;;  %s1304_s10 = scalar_lea.hbm %s1358_s5, %s715_s9 }
  0x6f   : > { %737 = vmatpush3.bf16.msra.mxu0 %v863_v1  ;;  %757 = vmatpush3.bf16.msra.mxu1 %v871_v4  ;;  %v868_v9 = vld [vmem:[#allocation6 + $0x28] sm:$0xff]   ;;  %v869_v10 = vld [vmem:[#allocation6 + $0x30] sm:$0xff]   ;;  %v870_v11 = vld [vmem:[#allocation6 + $0x38] sm:$0xff]   ;;  %s569_s15 = sshll.u32 %s306_s11, 4  ;;  %s556_s25 = scalar_lea.sflag [#allocation5], %s1278_s13  ;;  %s1306_s15 = int_to_ptr.vmem [resolvable:$true] %s569_s15 }
  0x70   : > { %738 = vmatprep.subr.bf16.mxu0 %v1060_v0  ;;  %758 = vmatprep.subr.bf16.mxu1 %v1060_v0  ;;  %v317_v12 = vld [vmem:[%s1282_s17] sm:$0xf]  ;;  %v875_v14 = vld [vmem:[#allocation8 + $0x20] sm:$0xff]   ;;  %v876_v15 = vld [vmem:[#allocation8 + $0x28] sm:$0xff]   ;;  %s967_s21 = scalar_lea.vmem %s1306_s15, 128  ;;  %p1373_p12 = scmp.ne.s32.totalorder %s1369_s8, 0 }
  0x71   : > { %v874_v13 = vld [vmem:[#allocation8 + $0x18] sm:$0xff]   ;;  %v877_v16 = vld [vmem:[#allocation8 + $0x30] sm:$0xff]   ;;  %p968_p8 = scmp.ne.s32.totalorder %s1306_s15, %s967_s21  ;;  %s1062_s16 = smov [#allocation9]  }
  0x72   : > { %v878_v17 = vld [vmem:[#allocation8 + $0x38] sm:$0xff]   ;;  %s971_s17 = sshll.u32 %s1062_s16, 4  ;;  %s972_s17 = int_to_ptr.vmem [resolvable:$false] %s971_s17 }
  0x73   : > { %739 = vmatpush3.bf16.msra.mxu0 %v864_v2  ;;  %759 = vmatpush3.bf16.msra.mxu1 %v872_v6  ;;  %v696_v18 = vld [vmem:[%s1355_s2] ss:$0 sm:$0xff]  ;;  %p969_p1 = pnand %p968_p8, %p1373_p12  ;;  %s973_s26 = scalar_lea.vmem %s972_s17, 256 }
  0x74   : > { %740 = vmatprep.subr.bf16.mxu0 %v1060_v0  ;;  %760 = vmatprep.subr.bf16.mxu1 %v1060_v0  ;;  %v713_v30 = vld [vmem:[%s1357_s4] ss:$0 sm:$0xff]  ;;  %p974_p3 = scmp.lt.s32.totalorder %s1306_s15, %s972_s17  ;;  %p975_p5 = scmp.lt.s32.totalorder %s973_s26, %s967_s21 }
  0x75   : > { %p970_p10 = pneg %p969_p1 }
  0x76   : > { %p976_p9 = por %p975_p5, %p974_p3 }
  0x77   : > { %741 = vmatpush3.bf16.msra.mxu0 %v865_v3  ;;  %761 = vmatpush3.bf16.msra.mxu1 %v873_v8 }
  0x78   : > { %742 = vmatprep.subr.bf16.mxu0 %v1060_v0  ;;  %762 = vmatprep.subr.bf16.mxu1 %v1060_v0  ;;  %p977_p11 = pnand %p976_p9, %p970_p10 }
  0x7b   : > { %743 = vmatpush3.bf16.msra.mxu0 %v866_v5  ;;  %763 = vmatpush3.bf16.msra.mxu1 %v874_v13 }
  0x7c   : > { %744 = vmatprep.subr.bf16.mxu0 %v1060_v0  ;;  %764 = vmatprep.subr.bf16.mxu1 %v1060_v0 }
  0x7f   : > { %745 = vmatpush3.bf16.msra.mxu0 %v867_v7  ;;  %765 = vmatpush3.bf16.msra.mxu1 %v875_v14 }
  0x80   : > { %746 = vmatprep.subr.bf16.mxu0 %v1060_v0  ;;  %766 = vmatprep.subr.bf16.mxu1 %v1060_v0 }
  0x83   : > { %747 = vmatpush3.bf16.msra.mxu0 %v868_v9  ;;  %767 = vmatpush3.bf16.msra.mxu1 %v876_v15 }
  0x84   : > { %748 = vmatprep.subr.bf16.mxu0 %v1060_v0  ;;  %768 = vmatprep.subr.bf16.mxu1 %v1060_v0 }
  0x87   : > { %749 = vmatpush3.bf16.msra.mxu0 %v869_v10  ;;  %769 = vmatpush3.bf16.msra.mxu1 %v877_v16 }
  0x88   : > { %750 = vmatprep.subr.bf16.mxu0 %v1060_v0  ;;  %770 = vmatprep.subr.bf16.mxu1 %v1060_v0 }
  0x8b   : > { %751 = vmatpush3.bf16.msra.mxu0 %v870_v11  ;;  %771 = vmatpush3.bf16.msra.mxu1 %v878_v17 }
  0x8e   : > { %753 = vmatmul.mubr.bf16.vlgmr.msra.gmra.mrb[0].mxu0 %v317_v12 }
 0x161   : > { %v423_v19 = vpop.f32.mrb[0].mxu0 }
 0x162   : > { %v424_v20 = vadd.f32 %v696_v18, %v423_v19  ;;  %v754_v21 = vpop.f32.mrb[1].mxu0 }
 0x163   : > { %v426_v22 = vpop.f32.mrb[2].mxu0 }
 0x164   : > { %v430_v23 = vmul.f32 0.70710677, %v424_v20  ;;  %v755_v24 = vpop.f32.mrb[3].mxu0  ;;  %v429_v26 = vmul.f32 0.5, %v424_v20 }
 0x166   : > { %879 = verf.f32 %v430_v23 }
 0x170   : > { %v880_v25 = vpop.eup %879 }
 0x171   : > { %v432_v27 = vadd.f32 1.0, %v880_v25 }
 0x173   : > { %v433_v28 = vmul.f32 %v432_v27, %v429_v26 }
 0x175   : > { %v435_v29 = vpack.c.bf16 %v433_v28, %v433_v28 }
 0x177   : > { %773 = vmatmul.mubr.bf16.vlgmr.msra.gmra.mrb[0].mxu1 %v435_v29 }
 0x24a   : > { %v534_v31 = vpop.f32.mrb[0].mxu1 }
 0x24b   : > { %v553_v32 = vadd.f32 %v713_v30, %v534_v31  ;;  %v774_v33 = vpop.f32.mrb[1].mxu1 }
 0x24c   : > { %v537_v34 = vpop.f32.mrb[2].mxu1 }
 0x24d   : > { %554 = vst [vmem:[%s306_s11] sm:$0xff] %v553_v32  ;;  %v775_v35 = vpop.f32.mrb[3].mxu1 }
 0x24e   : > { %980 = shalt.err (!%p977_p11)
}
 0x24f   : > { %s981_s13 = scalar_lea.hbm %s1304_s10, 128  ;;  %s985_s24 = scalar_lea.hbm %s1358_s5, 256 }
 0x250   : > { %p982_p0 = scmp.ne.s32.totalorder %s1304_s10, %s981_s13  ;;  %p986_p6 = scmp.lt.u32.totalorder %s1304_s10, %s1358_s5 }
 0x251   : > { %p987_p7 = scmp.lt.u32.totalorder %s985_s24, %s981_s13  ;;  %p989_p8 = scmp.lt.u32.totalorder %s981_s13, %s1304_s10 }
 0x252   : > { %p983_p4 = pnand %p982_p0, %p1373_p12 }
 0x253   : > { %p988_p2 = por %p987_p7, %p986_p6 }
 0x254   : > { %p984_p13 = pneg %p983_p4 }
 0x255   : > { %p990_p1 = por %p989_p8, %p988_p2 }
 0x257   : > { %p991_p10 = pnand %p990_p1, %p984_p13 }
 0x259   : > { %994 = shalt.err (!%p991_p10)
}
 0x25a   : > { %786 = dma.vmem_to_hbm [thread:$0]  (%p1373_p12), %s1306_s15, 128, %s1304_s10, %s556_s25  }
 0x25b PF: > { %s581_s11 = sand.u32 1, %s1033_s18   ;;  %p1374_p3 = scmp.ne.s32.totalorder %s1366_s29, 0 }
 0x25c   : > { %p1375_p5 = scmp.ge.s32.totalorder %s1053_s23, 2  ;;  %s582_s27 = scalar_lea.sflag [#allocation5], %s581_s11 }
 0x25e   : > { %p800_p9 = pnand %p1375_p5, %p1374_p3 }
 0x260   : > { %1028 = dma.done.wait (!%p800_p9), %s582_s27, 128  }
 0x261   : > { %1030 = vsyncadd (!%p800_p9), %s582_s27, 4294967168  ;;  %s22_s23 = sadd.s32 1, %s1053_s23   ;;  %s1376_s18 = smov %s1037_s19 }
 0x262   : > { %p19_p11 = scmp.ge.s32.totalorder %s22_s23, 4   ;;  %s1377_s19 = smov %s1041_s20 }
 0x263   : > { %s1378_s20 = smov %s1235_s6  ;;  %s1379_s21 = smov %s1049_s22 }
 0x264   : > { %s1380_s22 = smov %s1382_s12  ;;  %21 = sbr.rel (!%p19_p11) target bundleno = 7 (0x7), region = 106 }
 0x26b   :  { %587 = vsyncpa [#allocation4], 1 }
 0x26c   :  { %589 = vsyncpa [#allocation4 + $0x1], 1 }
 0x26d   :  { %590 = vsyncpa [#allocation7], 1 }
 0x26e   :  { %591 = vsyncpa [#allocation5], 1 }
 0x26f   :  { %593 = vsyncpa [#allocation5 + $0x1], 1 }

</bundles_post_ra>
